<compile_context>
chip_gen: v5e
topology: v5e:2x2
jax: 0.10.0
libtpu: 0.0.40
codegen_flags: <defaults>
</compile_context>

<pallas_src>
import functools

import jax
import jax.numpy as jnp
from jax.experimental import pallas as pl
from jax.experimental.pallas import tpu as pltpu

EPS = 1e-5
LANE = 128


def _round_up(n, m=LANE):
    return ((n + m - 1) // m) * m


def _pad2(a, rows, cols, dtype=None):
    a = jnp.pad(a, ((0, rows - a.shape[0]), (0, cols - a.shape[1])))
    return a.astype(dtype) if dtype is not None else a


def _bn_relu(h, gamma, beta):
    """Training-mode BatchNorm1d (biased variance, eps=1e-5) + ReLU.

    Two-pass variance: var = mean((h - mean)^2). h: (B, C) f32,
    gamma/beta: (1, C) f32. Zero-padded columns (gamma=beta=0, h=0) stay 0.
    """
    inv_n = 1.0 / h.shape[0]                       # static batch size
    mean = jnp.sum(h, axis=0, keepdims=True) * inv_n
    d = h - mean
    var = jnp.sum(d * d, axis=0, keepdims=True) * inv_n
    scale = gamma * jax.lax.rsqrt(var + EPS)       # EUP rsqrt
    return jnp.maximum(d * scale + beta, 0.0)


def net_kernel(x_ref,
               w1_ref, g1_ref, be1_ref,
               w2_ref, g2_ref, be2_ref,
               w3_ref, b3_ref,
               out_ref):
    x = x_ref[...]                                 # bf16 (B, K1p)

    # layer1: Linear (bias dropped; it cancels in training-mode BN) -> BN -> ReLU
    h1 = jnp.dot(x, w1_ref[...], preferred_element_type=jnp.float32)
    h1 = _bn_relu(h1, g1_ref[...], be1_ref[...])

    # layer2: Linear -> BN -> ReLU
    h2 = jnp.dot(h1.astype(jnp.bfloat16), w2_ref[...],
                 preferred_element_type=jnp.float32)
    h2 = _bn_relu(h2, g2_ref[...], be2_ref[...])

    # layer3: Linear — lane-dense (128-padded) f32 store
    out = jnp.dot(h2.astype(jnp.bfloat16), w3_ref[...],
                  preferred_element_type=jnp.float32)
    out_ref[...] = out + b3_ref[...]


def prepare_params(params):
    """One-time: pad every feature axis to a multiple of 128 and cast matmul
    operands to bf16. b1/b2 are intentionally omitted (no-ops under BN)."""
    in_dim, h1 = params["w1"].shape
    h2 = params["w2"].shape[1]
    out_dim = params["w3"].shape[1]
    kp, h1p, h2p, outp = (_round_up(d) for d in (in_dim, h1, h2, out_dim))

    padded = {
        "w1": _pad2(params["w1"], kp, h1p, jnp.bfloat16),
        "g1": _pad2(params["g1"], 1, h1p),
        "be1": _pad2(params["be1"], 1, h1p),
        "w2": _pad2(params["w2"], h1p, h2p, jnp.bfloat16),
        "g2": _pad2(params["g2"], 1, h2p),
        "be2": _pad2(params["be2"], 1, h2p),
        "w3": _pad2(params["w3"], h2p, outp, jnp.bfloat16),
        "b3": _pad2(params["b3"], 1, outp),
    }
    # Materialize on device now so nothing is re-padded per call.
    padded = jax.tree_util.tree_map(jnp.asarray, padded)
    return padded, in_dim, out_dim


def make_net_forward(padded_params, in_dim, out_dim):
    """Returns a jitted forward(x) closing over the pre-padded bf16 params."""
    pp = padded_params
    kp = pp["w1"].shape[0]
    outp = pp["b3"].shape[1]
    vmem = pl.BlockSpec(memory_space=pltpu.MemorySpace.VMEM)

    @jax.jit
    def forward(x):
        batch = x.shape[0]
        # Keep the output store sublane-dense; arbitrary batch would also
        # require masking padded rows out of the BN statistics.
        assert batch % 8 == 0, "batch must be a multiple of 8"
        xp = _pad2(x, batch, kp, jnp.bfloat16)     # only per-call prep
        args = (xp,
                pp["w1"], pp["g1"], pp["be1"],
                pp["w2"], pp["g2"], pp["be2"],
                pp["w3"], pp["b3"])
        out_padded = pl.pallas_call(
            net_kernel,
            out_shape=jax.ShapeDtypeStruct((batch, outp), jnp.float32),
            in_specs=[vmem] * len(args),
            out_specs=vmem,
        )(*args)
        return out_padded[:, :out_dim]

    return forward


def init_params(key, in_dim, n_hidden_1, n_hidden_2, out_dim):
    """Deterministic init mimicking PyTorch defaults (uniform +/- 1/sqrt(fan_in)).
    Weights stored pre-transposed as (fan_in, fan_out)."""
    ks = jax.random.split(key, 6)

    def linear(kw, kb, fan_in, fan_out):
        bound = 1.0 / jnp.sqrt(fan_in)
        w = jax.random.uniform(kw, (fan_in, fan_out), jnp.float32, -bound, bound)
        b = jax.random.uniform(kb, (1, fan_out), jnp.float32, -bound, bound)
        return w, b

    w1, b1 = linear(ks[0], ks[1], in_dim, n_hidden_1)
    w2, b2 = linear(ks[2], ks[3], n_hidden_1, n_hidden_2)
    w3, b3 = linear(ks[4], ks[5], n_hidden_2, out_dim)
    return {
        "w1": w1, "b1": b1,
        "g1": jnp.ones((1, n_hidden_1), jnp.float32),
        "be1": jnp.zeros((1, n_hidden_1), jnp.float32),
        "w2": w2, "b2": b2,
        "g2": jnp.ones((1, n_hidden_2), jnp.float32),
        "be2": jnp.zeros((1, n_hidden_2), jnp.float32),
        "w3": w3, "b3": b3,
    }


def reference_forward(x, p, matmul_dtype=jnp.float32):
    """Pure-JAX reference of the PyTorch math, *including* b1/b2 (they cancel
    under training-mode BN). matmul_dtype=bf16 mirrors the kernel precision."""

    def mm(a, w):
        return jnp.dot(a.astype(matmul_dtype), w.astype(matmul_dtype),
                       preferred_element_type=jnp.float32)

    def bn(h, gamma, beta):
        mean = jnp.mean(h, axis=0, keepdims=True)
        var = jnp.mean((h - mean) ** 2, axis=0, keepdims=True)
        return (h - mean) * jax.lax.rsqrt(var + EPS) * gamma + beta

    h = jnp.maximum(bn(mm(x, p["w1"]) + p["b1"], p["g1"], p["be1"]), 0.0)
    h = jnp.maximum(bn(mm(h, p["w2"]) + p["b2"], p["g2"], p["be2"]), 0.0)
    return mm(h, p["w3"]) + p["b3"]


if __name__ == "__main__":
    in_dim, n_hidden_1, n_hidden_2, out_dim = 32, 64, 32, 10
    batch = 16

    key = jax.random.PRNGKey(0)
    kx, kp = jax.random.split(key)
    x = jax.random.normal(kx, (batch, in_dim), jnp.float32)
    params = init_params(kp, in_dim, n_hidden_1, n_hidden_2, out_dim)

    padded_params, in_d, out_d = prepare_params(params)
    net_forward = make_net_forward(padded_params, in_d, out_d)

    out = jax.block_until_ready(net_forward(x))
    # Second call exercises the hoisted-prep, jitted fast path.
    out = jax.block_until_ready(net_forward(x))
    assert out.shape == (batch, out_dim)

    # Tight check against a reference that mirrors the kernel's precision
    # (bf16 matmul operands, f32 accumulation / BN / ReLU). The reference
    # keeps b1/b2; the kernel drops them — training-mode BN makes them no-ops.
    ref_bf16 = reference_forward(x, params, jnp.bfloat16)
    assert jnp.allclose(out, ref_bf16, atol=1e-3, rtol=1e-3)

    # Gross semantic sanity vs. the pure-f32 PyTorch math: any structural bug
    # would be O(1); remaining difference is only bf16 operand rounding.
    ref_f32 = reference_forward(x, params, jnp.float32)
    assert float(jnp.max(jnp.abs(out - ref_f32))) < 0.5

    # TODO(synk): eval-mode BatchNorm (running stats) is not modelled; the
    # module is reproduced in its freshly-constructed training-mode state.
    print("KERNEL_OK")
</pallas_src>

<mosaic_0001>
module attributes {stable_mosaic.version = 11 : i64} {
  func.func @net_kernel(%arg0: memref<16x128xbf16, #tpu.memory_space<vmem>>, %arg1: memref<128x128xbf16, #tpu.memory_space<vmem>>, %arg2: memref<1x128xf32, #tpu.memory_space<vmem>>, %arg3: memref<1x128xf32, #tpu.memory_space<vmem>>, %arg4: memref<128x128xbf16, #tpu.memory_space<vmem>>, %arg5: memref<1x128xf32, #tpu.memory_space<vmem>>, %arg6: memref<1x128xf32, #tpu.memory_space<vmem>>, %arg7: memref<128x128xbf16, #tpu.memory_space<vmem>>, %arg8: memref<1x128xf32, #tpu.memory_space<vmem>>, %arg9: memref<16x128xf32, #tpu.memory_space<vmem>>) attributes {dimension_semantics = [], scalar_prefetch = 0 : i64, scratch_operands = 0 : i64, tpu.core_type = #tpu.core_type<tc>} {
    %c0 = arith.constant 0 : index
    %c0_0 = arith.constant 0 : index
    %0 = vector.load %arg0[%c0, %c0_0] : memref<16x128xbf16, #tpu.memory_space<vmem>>, vector<16x128xbf16>
    %c0_1 = arith.constant 0 : index
    %c0_2 = arith.constant 0 : index
    %1 = vector.load %arg1[%c0_1, %c0_2] : memref<128x128xbf16, #tpu.memory_space<vmem>>, vector<128x128xbf16>
    %cst = arith.constant dense<0.000000e+00> : vector<16x128xf32>
    %2 = tpu.matmul %0, %1, %cst {dimension_numbers = #tpu.dot_dimension_numbers<[1], [0], [0], [1], [0, 0, 1, 1], [], []>} : vector<16x128xbf16>, vector<128x128xbf16>, vector<16x128xf32> -> vector<16x128xf32>
    %c0_3 = arith.constant 0 : index
    %c0_4 = arith.constant 0 : index
    %3 = vector.load %arg2[%c0_3, %c0_4] : memref<1x128xf32, #tpu.memory_space<vmem>>, vector<1x128xf32>
    %c0_5 = arith.constant 0 : index
    %c0_6 = arith.constant 0 : index
    %4 = vector.load %arg3[%c0_5, %c0_6] : memref<1x128xf32, #tpu.memory_space<vmem>>, vector<1x128xf32>
    %cst_7 = arith.constant dense<0.000000e+00> : vector<128xf32>
    %5 = vector.multi_reduction <add>, %2, %cst_7 [0] : vector<16x128xf32> to vector<128xf32>
    %6 = vector.shape_cast %5 : vector<128xf32> to vector<1x128xf32>
    %cst_8 = arith.constant 6.250000e-02 : f32
    %7 = vector.broadcast %cst_8 : f32 to vector<1x128xf32>
    %8 = arith.mulf %6, %7 : vector<1x128xf32>
    %9 = vector.broadcast %8 : vector<1x128xf32> to vector<16x128xf32>
    %10 = arith.subf %2, %9 : vector<16x128xf32>
    %11 = arith.mulf %10, %10 : vector<16x128xf32>
    %cst_9 = arith.constant dense<0.000000e+00> : vector<128xf32>
    %12 = vector.multi_reduction <add>, %11, %cst_9 [0] : vector<16x128xf32> to vector<128xf32>
    %13 = vector.shape_cast %12 : vector<128xf32> to vector<1x128xf32>
    %cst_10 = arith.constant 6.250000e-02 : f32
    %14 = vector.broadcast %cst_10 : f32 to vector<1x128xf32>
    %15 = arith.mulf %13, %14 : vector<1x128xf32>
    %cst_11 = arith.constant 9.99999974E-6 : f32
    %16 = vector.broadcast %cst_11 : f32 to vector<1x128xf32>
    %17 = arith.addf %15, %16 : vector<1x128xf32>
    %18 = math.rsqrt %17 : vector<1x128xf32>
    %19 = arith.mulf %3, %18 : vector<1x128xf32>
    %20 = vector.broadcast %19 : vector<1x128xf32> to vector<16x128xf32>
    %21 = arith.mulf %10, %20 : vector<16x128xf32>
    %22 = vector.broadcast %4 : vector<1x128xf32> to vector<16x128xf32>
    %23 = arith.addf %21, %22 : vector<16x128xf32>
    %cst_12 = arith.constant 0.000000e+00 : f32
    %24 = vector.broadcast %cst_12 : f32 to vector<16x128xf32>
    %25 = arith.maximumf %23, %24 : vector<16x128xf32>
    %26 = arith.truncf %25 : vector<16x128xf32> to vector<16x128xbf16>
    %c0_13 = arith.constant 0 : index
    %c0_14 = arith.constant 0 : index
    %27 = vector.load %arg4[%c0_13, %c0_14] : memref<128x128xbf16, #tpu.memory_space<vmem>>, vector<128x128xbf16>
    %cst_15 = arith.constant dense<0.000000e+00> : vector<16x128xf32>
    %28 = tpu.matmul %26, %27, %cst_15 {dimension_numbers = #tpu.dot_dimension_numbers<[1], [0], [0], [1], [0, 0, 1, 1], [], []>} : vector<16x128xbf16>, vector<128x128xbf16>, vector<16x128xf32> -> vector<16x128xf32>
    %c0_16 = arith.constant 0 : index
    %c0_17 = arith.constant 0 : index
    %29 = vector.load %arg5[%c0_16, %c0_17] : memref<1x128xf32, #tpu.memory_space<vmem>>, vector<1x128xf32>
    %c0_18 = arith.constant 0 : index
    %c0_19 = arith.constant 0 : index
    %30 = vector.load %arg6[%c0_18, %c0_19] : memref<1x128xf32, #tpu.memory_space<vmem>>, vector<1x128xf32>
    %cst_20 = arith.constant dense<0.000000e+00> : vector<128xf32>
    %31 = vector.multi_reduction <add>, %28, %cst_20 [0] : vector<16x128xf32> to vector<128xf32>
    %32 = vector.shape_cast %31 : vector<128xf32> to vector<1x128xf32>
    %cst_21 = arith.constant 6.250000e-02 : f32
    %33 = vector.broadcast %cst_21 : f32 to vector<1x128xf32>
    %34 = arith.mulf %32, %33 : vector<1x128xf32>
    %35 = vector.broadcast %34 : vector<1x128xf32> to vector<16x128xf32>
    %36 = arith.subf %28, %35 : vector<16x128xf32>
    %37 = arith.mulf %36, %36 : vector<16x128xf32>
    %cst_22 = arith.constant dense<0.000000e+00> : vector<128xf32>
    %38 = vector.multi_reduction <add>, %37, %cst_22 [0] : vector<16x128xf32> to vector<128xf32>
    %39 = vector.shape_cast %38 : vector<128xf32> to vector<1x128xf32>
    %cst_23 = arith.constant 6.250000e-02 : f32
    %40 = vector.broadcast %cst_23 : f32 to vector<1x128xf32>
    %41 = arith.mulf %39, %40 : vector<1x128xf32>
    %cst_24 = arith.constant 9.99999974E-6 : f32
    %42 = vector.broadcast %cst_24 : f32 to vector<1x128xf32>
    %43 = arith.addf %41, %42 : vector<1x128xf32>
    %44 = math.rsqrt %43 : vector<1x128xf32>
    %45 = arith.mulf %29, %44 : vector<1x128xf32>
    %46 = vector.broadcast %45 : vector<1x128xf32> to vector<16x128xf32>
    %47 = arith.mulf %36, %46 : vector<16x128xf32>
    %48 = vector.broadcast %30 : vector<1x128xf32> to vector<16x128xf32>
    %49 = arith.addf %47, %48 : vector<16x128xf32>
    %cst_25 = arith.constant 0.000000e+00 : f32
    %50 = vector.broadcast %cst_25 : f32 to vector<16x128xf32>
    %51 = arith.maximumf %49, %50 : vector<16x128xf32>
    %52 = arith.truncf %51 : vector<16x128xf32> to vector<16x128xbf16>
    %c0_26 = arith.constant 0 : index
    %c0_27 = arith.constant 0 : index
    %53 = vector.load %arg7[%c0_26, %c0_27] : memref<128x128xbf16, #tpu.memory_space<vmem>>, vector<128x128xbf16>
    %cst_28 = arith.constant dense<0.000000e+00> : vector<16x128xf32>
    %54 = tpu.matmul %52, %53, %cst_28 {dimension_numbers = #tpu.dot_dimension_numbers<[1], [0], [0], [1], [0, 0, 1, 1], [], []>} : vector<16x128xbf16>, vector<128x128xbf16>, vector<16x128xf32> -> vector<16x128xf32>
    %c0_29 = arith.constant 0 : index
    %c0_30 = arith.constant 0 : index
    %55 = vector.load %arg8[%c0_29, %c0_30] : memref<1x128xf32, #tpu.memory_space<vmem>>, vector<1x128xf32>
    %56 = vector.broadcast %55 : vector<1x128xf32> to vector<16x128xf32>
    %57 = arith.addf %54, %56 : vector<16x128xf32>
    %c0_31 = arith.constant 0 : index
    %c0_32 = arith.constant 0 : index
    %58 = vector.load %arg9[%c0_31, %c0_32] : memref<16x128xf32, #tpu.memory_space<vmem>>, vector<16x128xf32>
    tpu.vector_store %arg9[%c0_31, %c0_32], %57 {strides = array<i32>} : memref<16x128xf32, #tpu.memory_space<vmem>>, vector<16x128xf32>,
    return
  }
}

</mosaic_0001>

<bundles_post_ra>
// kernel: forward.1
= control target key start
LH: loop header
LB: loop body
LE: loop exit
PB: predicated region body
PF: predicated region fallthrough
CT: control target
= control target key end

     0   :  { %14 = vsyncpa [#allocation3], 0  ;;  %s772_s0 = inlined_call_operand.vmem [shape: bf16[16,128], index: 0, kind: input, shape index: {}]   ;;  %s773_s1 = inlined_call_operand.hbm [shape: bf16[128,128], index: 1, kind: input, shape index: {}]   ;;  %s774_s2 = inlined_call_operand.vmem [shape: f32[1,128], index: 2, kind: input, shape index: {}]   ;;  %s775_s3 = inlined_call_operand.vmem [shape: f32[1,128], index: 3, kind: input, shape index: {}, may-alias: {3,6}]   ;;  %s776_s4 = inlined_call_operand.hbm [shape: bf16[128,128], index: 4, kind: input, shape index: {}]   ;;  %s777_s5 = inlined_call_operand.vmem [shape: f32[1,128], index: 5, kind: input, shape index: {}]   ;;  %s778_s6 = inlined_call_operand.vmem [shape: f32[1,128], index: 6, kind: input, shape index: {}, may-alias: {3,6}]   ;;  %s779_s7 = inlined_call_operand.hbm [shape: bf16[128,128], index: 7, kind: input, shape index: {}]   ;;  %s780_s8 = inlined_call_operand.vmem [shape: f32[1,128], index: 8, kind: input, shape index: {}]   ;;  %s781_s9 = inlined_call_operand.hbm [shape: f32[16,128], index: 9, kind: output, shape index: {}]  }
   0x1   :  { %15 = vsyncpa [#allocation6], 0 }
   0x2   :  { %16 = vsyncpa [#allocation4], 0  ;;  %s40_s11 = sshll.u32 %s776_s4, 4  ;;  %s684_s12 = smov [#allocation5]   ;;  %s41_s11 = int_to_ptr.hbm [resolvable:$true] %s40_s11 }
   0x3   :  { %s42_s13 = sshll.u32 %s684_s12, 4  ;;  %s23_s16 = sshll.u32 %s773_s1, 4  ;;  %s43_s13 = int_to_ptr.vmem [resolvable:$true] %s42_s13  ;;  %s24_s16 = int_to_ptr.hbm [resolvable:$true] %s23_s16 }
   0x4   :  { %s685_s17 = smov 64   ;;  %s686_s18 = smov 4  }
   0x5   :  { %48 = dma.hbm_to_vmem [thread:$0]  %s41_s11, 1024, %s43_s13, [#allocation6], %s685_s17, %s685_s17, %s686_s18  }
   0x6   :  { %s687_s19 = smov [#allocation2]   ;;  %s57_s23 = sshll.u32 %s779_s7, 4  ;;  %s58_s23 = int_to_ptr.hbm [resolvable:$true] %s57_s23 }
   0x7   :  { %s25_s20 = sshll.u32 %s687_s19, 4  ;;  %s688_s4 = smov [#allocation7]   ;;  %s26_s20 = int_to_ptr.vmem [resolvable:$true] %s25_s20 }
   0x8   :  { %31 = dma.hbm_to_vmem [thread:$0]  %s24_s16, 1024, %s26_s20, [#allocation3], %s685_s17, %s685_s17, %s686_s18  }
   0x9   :  { %s59_s24 = sshll.u32 %s688_s4, 4  ;;  %s60_s24 = int_to_ptr.vmem [resolvable:$true] %s59_s24 }
   0xa   :  { %65 = dma.hbm_to_vmem [thread:$0]  %s58_s23, 1024, %s60_s24, [#allocation6], %s685_s17, %s685_s17, %s686_s18  }
   0xb   :  { %678 = dma.done.wait [#allocation3], 1024  }
   0xc   :  { %679 = vsyncadd [#allocation3], 4294966272 }
   0xd   :  { %680 = dma.done.wait [#allocation6], 2048  }
   0xe   :  { %681 = vsyncadd [#allocation6], 4294965248  ;;  %v550_v0 = vld [vmem:[#allocation2 + $0x38] sm:$0xff]  ;;  %v549_v1 = vld [vmem:[#allocation2 + $0x30] sm:$0xff]  ;;  %s689_s10 = smov [#allocation8]   ;;  %s690_s14 = smov 128  }
   0xf   :  { %152 = vmatpush.bf16.msra.mxu0 %v550_v0  ;;  %v548_v2 = vld [vmem:[#allocation2 + $0x28] sm:$0xff]  ;;  %v547_v3 = vld [vmem:[#allocation2 + $0x20] sm:$0xff]  ;;  %v546_v4 = vld [vmem:[#allocation2 + $0x18] sm:$0xff]  ;;  %s426_s11 = sshll.u32 %s689_s10, 4  ;;  %s691_s15 = smov 8   ;;  %s427_s11 = int_to_ptr.vmem [resolvable:$true] %s426_s11 }
  0x10   :  { %v545_v5 = vld [vmem:[#allocation2 + $0x10] sm:$0xff]  ;;  %v544_v6 = vld [vmem:[#allocation2 + $0x8] sm:$0xff]  ;;  %v543_v7 = vld [vmem:[#allocation2] sm:$0xff] }
  0x11   :  { %v542_v8 = vld [vmem:[%s772_s0] sm:$0xff]  ;;  %v558_v13 = vld [vmem:[#allocation5 + $0x38] sm:$0xff]  ;;  %v557_v16 = vld [vmem:[#allocation5 + $0x30] sm:$0xff] }
  0x12   :  { %277 = vmatpush.bf16.msra.mxu1 %v558_v13  ;;  %v556_v19 = vld [vmem:[#allocation5 + $0x28] sm:$0xff]  ;;  %v555_v22 = vld [vmem:[#allocation5 + $0x20] sm:$0xff]  ;;  %v554_v27 = vld [vmem:[#allocation5 + $0x18] sm:$0xff] }
  0x13   :  { %153 = vmatpush.bf16.msra.mxu0 %v549_v1  ;;  %v553_v30 = vld [vmem:[#allocation5 + $0x10] sm:$0xff]  ;;  %v552_v33 = vld [vmem:[#allocation5 + $0x8] sm:$0xff]  ;;  %v551_v35 = vld [vmem:[#allocation5] sm:$0xff] }
  0x14   :  { %v166_v45 = vld [vmem:[%s774_s2] sm:$0x1]  ;;  %v566_v62 = vld [vmem:[#allocation7 + $0x38] sm:$0xff]  ;;  %v565_v1 = vld [vmem:[#allocation7 + $0x30] sm:$0xff] }
  0x15   :  { %v575_v50 = vld [vmem:[%s775_s3] ss:$0 sm:$0xff]  ;;  %406 = vmatpush.bf16.msra.mxu2 %v566_v62 }
  0x16   :  { %278 = vmatpush.bf16.msra.mxu1 %v557_v16 }
  0x17   :  { %154 = vmatpush.bf16.msra.mxu0 %v548_v2 }
  0x19   :  { %407 = vmatpush.bf16.msra.mxu2 %v565_v1 }
  0x1a   :  { %279 = vmatpush.bf16.msra.mxu1 %v556_v19 }
  0x1b   :  { %155 = vmatpush.bf16.msra.mxu0 %v547_v3 }
  0x1e   :  { %280 = vmatpush.bf16.msra.mxu1 %v555_v22 }
  0x1f   :  { %156 = vmatpush.bf16.msra.mxu0 %v546_v4  ;;  %v564_v4 = vld [vmem:[#allocation7 + $0x28] sm:$0xff] }
  0x20   :  { %408 = vmatpush.bf16.msra.mxu2 %v564_v4 }
  0x22   :  { %281 = vmatpush.bf16.msra.mxu1 %v554_v27 }
  0x23   :  { %157 = vmatpush.bf16.msra.mxu0 %v545_v5 }
  0x26   :  { %282 = vmatpush.bf16.msra.mxu1 %v553_v30  ;;  %v291_v30 = vld [vmem:[%s777_s5] sm:$0x1] }
  0x27   :  { %158 = vmatpush.bf16.msra.mxu0 %v544_v6 }
  0x2a   :  { %283 = vmatpush.bf16.msra.mxu1 %v552_v33 }
  0x2b   :  { %159 = vmatpush.bf16.msra.mxu0 %v543_v7  ;;  %v563_v7 = vld [vmem:[#allocation7 + $0x20] sm:$0xff] }
  0x2c   :  { %409 = vmatpush.bf16.msra.mxu2 %v563_v7 }
  0x2e   :  { %160 = vmatmul.bf16.vlgmr.msra.gmra.mxu0 %v542_v8  ;;  %284 = vmatpush.bf16.msra.mxu1 %v551_v35  ;;  %v576_v35 = vld [vmem:[%s778_s6] ss:$0 sm:$0xff]  ;;  %s428_s6 = sshll.u32 %s781_s9, 4  ;;  %s429_s6 = int_to_ptr.hbm [resolvable:$true] %s428_s6 }
  0xab   :  { %v161_v9 = vpop.f32.mrf.mxu0 }
  0xb3   :  { %v163_v10 = vpop.f32.mrf.mxu0 }
  0xb4   :  { %v168_v11 = vadd.f32 %v163_v10, %v161_v9 }
  0xb6   :  { %v169_v12 = vrot.slane %v168_v11, 4 }
  0xb8   :  { %v170_v14 = vadd.f32 %v169_v12, %v168_v11  ;;  %v562_v12 = vld [vmem:[#allocation7 + $0x18] sm:$0xff] }
  0xb9   :  { %410 = vmatpush.bf16.msra.mxu2 %v562_v12 }
  0xba   :  { %v171_v15 = vrot.slane %v170_v14, 2 }
  0xbc   :  { %v172_v17 = vadd.f32 %v171_v15, %v170_v14  ;;  %v561_v15 = vld [vmem:[#allocation7 + $0x10] sm:$0xff] }
  0xbd   :  { %411 = vmatpush.bf16.msra.mxu2 %v561_v15 }
  0xbe   :  { %v173_v18 = vrot.slane %v172_v17, 1 }
  0xc0   :  { %v174_v20 = vadd.f32 %v173_v18, %v172_v17  ;;  %v560_v18 = vld [vmem:[#allocation7 + $0x8] sm:$0xff] }
  0xc1   :  { %412 = vmatpush.bf16.msra.mxu2 %v560_v18 }
  0xc2   :  { %v175_v21 = vmul.f32 0.0625, %v174_v20  ;;  %v559_v20 = vld [vmem:[#allocation7] sm:$0xff] }
  0xc4   :  { %v176_v23 = vsub.f32 %v161_v9, %v175_v21  ;;  %v177_v24 = vsub.f32 %v163_v10, %v175_v21 }
  0xc5   :  { %413 = vmatpush.bf16.msra.mxu2 %v559_v20 }
  0xc6   :  { %v178_v25 = vmul.f32 %v176_v23, %v176_v23  ;;  %v179_v26 = vmul.f32 %v177_v24, %v177_v24 }
  0xc8   :  { %v180_v28 = vadd.f32 %v179_v26, %v178_v25 }
  0xca   :  { %v181_v29 = vrot.slane %v180_v28, 4 }
  0xcc   :  { %v182_v31 = vadd.f32 %v181_v29, %v180_v28 }
  0xce   :  { %v183_v32 = vrot.slane %v182_v31, 2 }
  0xd0   :  { %v184_v34 = vadd.f32 %v183_v32, %v182_v31 }
  0xd2   :  { %v185_v36 = vrot.slane %v184_v34, 1 }
  0xd4   :  { %v186_v37 = vadd.f32 %v185_v36, %v184_v34 }
  0xd6   :  { %v187_v38 = vmul.f32 0.0625, %v186_v37 }
  0xd8   :  { %v188_v39 = vadd.f32 1e-05, %v187_v38 }
  0xda   :  { %578 = vrsqrt.f32 %v188_v39  ;;  %vm195_vm1 = vweird.f32 %v188_v39 }
  0xe0   :  { %v579_v40 = vpop.eup %578 }
  0xe1   :  { %v190_v41 = vmul.f32 %v579_v40, %v188_v39  ;;  %vm196_vm0 = vweird.f32 %v579_v40 }
  0xe2   :  { %vm197_vm2 = vmor %vm195_vm1, %vm196_vm0 }
  0xe3   :  { %v191_v42 = vmul.f32 %v579_v40, %v190_v41 }
  0xe5   :  { %v192_v43 = vmul.f32 0.5, %v191_v42 }
  0xe7   :  { %v193_v44 = vsub.f32 1.5, %v192_v43  ;;  %v577_v43 = vld [vmem:[%s780_s8] ss:$0 sm:$0xff] }
  0xe9   :  { %v194_v46 = vmul.f32 %v579_v40, %v193_v44 }
  0xeb   :  { %v198_v47 = vsel %vm197_vm2, %v579_v40, %v194_v46 }
  0xec   :  { %v199_v48 = vmul.f32 %v198_v47, %v166_v45 }
  0xee   :  { %v201_v49 = vperm.slane %v199_v48, 0 }
  0xf0   :  { %v204_v51 = vmul.f32 %v201_v49, %v177_v24  ;;  %v203_v52 = vmul.f32 %v201_v49, %v176_v23 }
  0xf2   :  { %v208_v53 = vadd.f32 %v575_v50, %v203_v52  ;;  %v209_v54 = vadd.f32 %v575_v50, %v204_v51 }
  0xf4   :  { %v210_v55 = vmax.f32 %v208_v53, 0.0  ;;  %v211_v56 = vmax.f32 %v209_v54, 0.0 }
  0xf6   :  { %v212_v57 = vpack.c.bf16 %v211_v56, %v210_v55 }
  0xf8   :  { %285 = vmatmul.bf16.vlgmr.msra.gmra.mxu1 %v212_v57 }
 0x175   :  { %v286_v58 = vpop.f32.mrf.mxu1 }
 0x17d   :  { %v288_v59 = vpop.f32.mrf.mxu1 }
 0x17e   :  { %v293_v60 = vadd.f32 %v288_v59, %v286_v58 }
 0x180   :  { %v294_v61 = vrot.slane %v293_v60, 4 }
 0x182   :  { %v295_v63 = vadd.f32 %v294_v61, %v293_v60 }
 0x184   :  { %v296_v0 = vrot.slane %v295_v63, 2 }
 0x186   :  { %v297_v2 = vadd.f32 %v296_v0, %v295_v63 }
 0x188   :  { %v298_v3 = vrot.slane %v297_v2, 1 }
 0x18a   :  { %v299_v5 = vadd.f32 %v298_v3, %v297_v2 }
 0x18c   :  { %v300_v6 = vmul.f32 0.0625, %v299_v5 }
 0x18e   :  { %v301_v8 = vsub.f32 %v286_v58, %v300_v6  ;;  %v302_v9 = vsub.f32 %v288_v59, %v300_v6 }
 0x190   :  { %v303_v10 = vmul.f32 %v301_v8, %v301_v8  ;;  %v304_v11 = vmul.f32 %v302_v9, %v302_v9 }
 0x192   :  { %v305_v13 = vadd.f32 %v304_v11, %v303_v10 }
 0x194   :  { %v306_v14 = vrot.slane %v305_v13, 4 }
 0x196   :  { %v307_v16 = vadd.f32 %v306_v14, %v305_v13 }
 0x198   :  { %v308_v17 = vrot.slane %v307_v16, 2 }
 0x19a   :  { %v309_v19 = vadd.f32 %v308_v17, %v307_v16 }
 0x19c   :  { %v310_v21 = vrot.slane %v309_v19, 1 }
 0x19e   :  { %v311_v22 = vadd.f32 %v310_v21, %v309_v19 }
 0x1a0   :  { %v312_v23 = vmul.f32 0.0625, %v311_v22 }
 0x1a2   :  { %v313_v24 = vadd.f32 1e-05, %v312_v23 }
 0x1a4   :  { %580 = vrsqrt.f32 %v313_v24  ;;  %vm320_vm4 = vweird.f32 %v313_v24 }
 0x1aa   :  { %v581_v25 = vpop.eup %580 }
 0x1ab   :  { %v315_v26 = vmul.f32 %v581_v25, %v313_v24  ;;  %vm321_vm3 = vweird.f32 %v581_v25 }
 0x1ac   :  { %vm322_vm5 = vmor %vm320_vm4, %vm321_vm3 }
 0x1ad   :  { %v316_v27 = vmul.f32 %v581_v25, %v315_v26 }
 0x1af   :  { %v317_v28 = vmul.f32 0.5, %v316_v27 }
 0x1b1   :  { %v318_v29 = vsub.f32 1.5, %v317_v28 }
 0x1b3   :  { %v319_v31 = vmul.f32 %v581_v25, %v318_v29 }
 0x1b5   :  { %v323_v32 = vsel %vm322_vm5, %v581_v25, %v319_v31 }
 0x1b6   :  { %v324_v33 = vmul.f32 %v323_v32, %v291_v30 }
 0x1b8   :  { %v326_v34 = vperm.slane %v324_v33, 0 }
 0x1ba   :  { %v329_v36 = vmul.f32 %v326_v34, %v302_v9  ;;  %v328_v37 = vmul.f32 %v326_v34, %v301_v8 }
 0x1bc   :  { %v333_v38 = vadd.f32 %v576_v35, %v328_v37  ;;  %v334_v39 = vadd.f32 %v576_v35, %v329_v36 }
 0x1be   :  { %v335_v40 = vmax.f32 %v333_v38, 0.0  ;;  %v336_v41 = vmax.f32 %v334_v39, 0.0 }
 0x1c0   :  { %v337_v42 = vpack.c.bf16 %v336_v41, %v335_v40 }
 0x1c2   :  { %414 = vmatmul.bf16.vlgmr.msra.gmra.mxu2 %v337_v42 }
 0x245   :  { %v415_v44 = vpop.f32.mrf.mxu2 }
 0x246   :  { %v416_v45 = vadd.f32 %v577_v43, %v415_v44 }
 0x248   :  { %420 = vst [vmem:[#allocation8] sm:$0xff] %v416_v45 }
 0x24d   :  { %v417_v46 = vpop.f32.mrf.mxu2 }
 0x24e   :  { %v418_v47 = vadd.f32 %v577_v43, %v417_v46 }
 0x250   :  { %421 = vst [vmem:[#allocation8 + $0x8] sm:$0xff] %v418_v47 }
 0x251   :  { %434 = dma.vmem_to_hbm [thread:$0]  %s427_s11, 256, %s429_s6, [#allocation4], %s690_s14, %s690_s14, %s691_s15  }
 0x252   :  { %682 = dma.done.wait [#allocation4], 256  }
 0x253   :  { %683 = vsyncadd [#allocation4], 4294967040 }
 0x254   :  { %439 = vsyncpa [#allocation3], 1 }
 0x255   :  { %440 = vsyncpa [#allocation6], 1 }
 0x256   :  { %441 = vsyncpa [#allocation4], 1 }

</bundles_post_ra>
